<compile_context>
chip_gen: v7x
topology: tpu7x:2x2x1
jax: 0.10.0
libtpu: 0.0.40
codegen_flags: <defaults>
</compile_context>

<pallas_src>
import math

import jax
import jax.numpy as jnp
from jax.experimental import pallas as pl
from jax.experimental.pallas import tpu as pltpu


def _round_up(a, b):
    return (a + b - 1) // b * b


def _make_kernel(n_valid, tile_n, num_tiles, dims):
    in_dim, h1_dim, h2_dim, out_dim = dims

    def kernel(xt_ref, w1t_ref, w2t_ref, w3t_ref, bias_ref, o_ref, m_ref, l_ref):
        i = pl.program_id(0)

        @pl.when(i == 0)
        def _init():
            m_ref[...] = jnp.full_like(m_ref, -jnp.inf)
            l_ref[...] = jnp.zeros_like(l_ref)

        bp = bias_ref[...]                       # (128, 3) packed column biases
        b1 = bp[:h1_dim, 0:1]                    # (32, 1)
        b2 = bp[:h2_dim, 1:2]                    # (16, 1)
        b3 = bp[:out_dim, 2:3]                   # (out_dim, 1)

        # x already arrives transposed: (in_dim, tile_n), batch on the 128-lane axis.
        xt = xt_ref[...]
        h = jnp.dot(w1t_ref[...], xt, preferred_element_type=jnp.float32) + b1
        h = jnp.maximum(h, 0.0)                  # ReLU
        h = jnp.dot(w2t_ref[...], h, preferred_element_type=jnp.float32) + b2
        h = jnp.maximum(h, 0.0)                  # ReLU
        logits_t = jnp.dot(w3t_ref[...], h, preferred_element_type=jnp.float32) + b3

        # store this tile's raw logits into the VMEM-resident output slab
        col0 = pl.multiple_of(i * tile_n, tile_n)
        o_ref[:, pl.ds(col0, tile_n)] = logits_t

        # --- online softmax(dim=0) statistics over the batch (lane axis) ---------------
        col = jax.lax.broadcasted_iota(jnp.int32, logits_t.shape, 1) + col0
        masked = jnp.where(col < n_valid, logits_t, -jnp.inf)     # mask batch padding
        tile_max = jnp.max(masked, axis=1, keepdims=True)         # (out_dim, 1)
        m_old = m_ref[...]
        m_new = jnp.maximum(m_old, tile_max)
        # exp(-inf - finite) = 0 -> padded columns never contribute to the sum;
        # at i==0: l=0 and exp(m_old - m_new)=0, so the rescale term vanishes.
        tile_sum = jnp.sum(jnp.exp(masked - m_new), axis=1, keepdims=True)
        l_ref[...] = l_ref[...] * jnp.exp(m_old - m_new) + tile_sum
        m_ref[...] = m_new

        # --- finalize: normalize the whole resident slab once, chunked per tile --------
        @pl.when(i == num_tiles - 1)
        def _finalize():
            m = m_ref[...]
            inv_l = 1.0 / l_ref[...]             # exact (out_dim scalars), not approx

            @pl.loop(0, num_tiles)
            def _(t):
                c0 = pl.multiple_of(t * tile_n, tile_n)
                blk = o_ref[:, pl.ds(c0, tile_n)]
                o_ref[:, pl.ds(c0, tile_n)] = jnp.exp(blk - m) * inv_l

    return kernel


def softmax_bnn_forward(x, params, *, tile_n=None, use_bf16=False, vmem_limit_bytes=None):
    """x: [N, input_dim] float32. Returns softmax(dim=0) probabilities, shape [N, out_dim]."""
    n, in_dim = x.shape
    assert n >= 1, "empty batch would make softmax(dim=0) ill-defined"
    h1_dim = params["w1"].shape[1]
    h2_dim = params["w2"].shape[1]
    out_dim = params["w3"].shape[1]

    # ---- per-generation VMEM budget (v7x: 64 MiB physical; v5e/v6e: 128 MiB) ----------
    if vmem_limit_bytes is None:
        try:
            cap = pltpu.get_tpu_info().vmem_capacity_bytes
        except Exception:
            cap = 64 * 1024 * 1024
        vmem_limit_bytes = max(min(int(cap * 3 // 4), 96 * 1024 * 1024), 16 * 1024 * 1024)

    x_bytes_per_elem = 2 if use_bf16 else 4

    # ---- tile sizing ------------------------------------------------------------------
    n128 = _round_up(n, 128)
    # resident output slab costs ~8 (sublane-padded) * n_pad * 4 B; keep headroom for it
    resident_bytes = 8 * n128 * 4 + 256 * 1024
    x_tile_budget = max(vmem_limit_bytes - resident_bytes, 1 << 20)
    # 2x for the double-buffered x tile
    max_tile = max(128, (x_tile_budget // (2 * x_bytes_per_elem * in_dim)) // 128 * 128)

    if tile_n is None:
        if n128 <= 4096:
            tile_n = n128            # fast path: whole batch in one grid step
        else:
            tile_n = min(2048, n128) # big lane-dense tiles: DMA-efficient, overhead-amortized
    tile_n = min(_round_up(max(tile_n, 128), 128), max_tile)
    n_pad = _round_up(n, tile_n)
    num_tiles = n_pad // tile_n
    grid = (num_tiles,)

    # ---- operands ----------------------------------------------------------------------
    # Pre-transpose x once (cheap XLA op, amortized across MC weight samples) -> lane-dense tiles.
    x_t = x.T                                              # (in_dim, n)
    if n_pad != n:
        x_t = jnp.pad(x_t, ((0, 0), (0, n_pad - n)))
    w1t = params["w1"].T                                   # (32, in_dim)
    w2t = params["w2"].T                                   # (16, 32)
    w3t = params["w3"].T                                   # (out_dim, 16)
    if use_bf16:
        # halve x HBM traffic; layer-1 matmul in bf16 with f32 accumulation (tolerance ~1e-2)
        x_t = x_t.astype(jnp.bfloat16)
        w1t = w1t.astype(jnp.bfloat16)

    # Pack the three tiny bias vectors into one operand (column j = layer j+1 bias).
    bias_pack = jnp.zeros((128, 3), jnp.float32)
    bias_pack = bias_pack.at[:h1_dim, 0].set(params["b1"].reshape(-1))
    bias_pack = bias_pack.at[:h2_dim, 1].set(params["b2"].reshape(-1))
    bias_pack = bias_pack.at[:out_dim, 2].set(params["b3"].reshape(-1))

    kernel = _make_kernel(n, tile_n, num_tiles, (in_dim, h1_dim, h2_dim, out_dim))

    flops = 2 * n_pad * (in_dim * h1_dim + h1_dim * h2_dim + h2_dim * out_dim)
    bytes_accessed = (x_bytes_per_elem * n_pad * in_dim
                      + 4 * (in_dim * h1_dim + h1_dim * h2_dim + h2_dim * out_dim
                             + 128 * 3 + n_pad * out_dim))

    out_t = pl.pallas_call(
        kernel,
        out_shape=jax.ShapeDtypeStruct((out_dim, n_pad), jnp.float32),
        grid_spec=pltpu.PrefetchScalarGridSpec(
            num_scalar_prefetch=0,
            grid=grid,
            in_specs=[
                pl.BlockSpec((in_dim, tile_n), lambda i: (0, i)),     # x^T: pipelined batch tiles
                pl.BlockSpec((h1_dim, in_dim), lambda i: (0, 0)),     # weights: VMEM-resident
                pl.BlockSpec((h2_dim, h1_dim), lambda i: (0, 0)),
                pl.BlockSpec((out_dim, h2_dim), lambda i: (0, 0)),
                pl.BlockSpec((128, 3), lambda i: (0, 0)),             # packed biases
            ],
            out_specs=pl.BlockSpec((out_dim, n_pad), lambda i: (0, 0)),  # resident accumulator
            scratch_shapes=[
                pltpu.VMEM((out_dim, 1), jnp.float32),   # running per-class max
                pltpu.VMEM((out_dim, 1), jnp.float32),   # running per-class sum of exp
            ],
        ),
        compiler_params=pltpu.CompilerParams(
            dimension_semantics=("arbitrary",),      # output block + stats reused across tiles
            vmem_limit_bytes=vmem_limit_bytes,
        ),
        cost_estimate=pl.CostEstimate(
            flops=flops,
            transcendentals=2 * n_pad * out_dim,
            bytes_accessed=bytes_accessed,
        ),
    )(x_t, w1t, w2t, w3t, bias_pack)

    # back to the PyTorch layout [N, out_dim]
    return out_t.T[:n]


def init_params(key, input_dim, output_dim, prior_sigma=0.1):
    """Mimics torchbnn.BayesLinear init and samples weights/biases once:
    w = w_mu + exp(w_log_sigma) * eps, with w_log_sigma = log(prior_sigma)."""
    sigma = math.exp(math.log(prior_sigma))
    dims = [(input_dim, 32), (32, 16), (16, output_dim)]
    params = {}
    for li, (fin, fout) in enumerate(dims, start=1):
        key, k_wmu, k_weps, k_bmu, k_beps = jax.random.split(key, 5)
        stdv = 1.0 / math.sqrt(fin)
        w_mu = jax.random.uniform(k_wmu, (fin, fout), jnp.float32, -stdv, stdv)
        w_eps = jax.random.normal(k_weps, (fin, fout), jnp.float32)
        b_mu = jax.random.uniform(k_bmu, (fout,), jnp.float32, -stdv, stdv)
        b_eps = jax.random.normal(k_beps, (fout,), jnp.float32)
        params[f"w{li}"] = w_mu + sigma * w_eps
        params[f"b{li}"] = b_mu + sigma * b_eps
    return params


def reference_forward(x, params):
    """Pure-JAX reference of the SoftmaxBNN forward pass (sampled weights fixed)."""
    h = jnp.maximum(x @ params["w1"] + params["b1"], 0.0)
    h = jnp.maximum(h @ params["w2"] + params["b2"], 0.0)
    logits = h @ params["w3"] + params["b3"]
    return jax.nn.softmax(logits, axis=0)    # nn.Softmax(dim=0): across the batch


if __name__ == "__main__":
    key = jax.random.PRNGKey(0)
    k_x, k_p = jax.random.split(key)

    # small shapes consistent with the module: x is [batch, input_dim]
    batch, input_dim, output_dim = 200, 16, 4
    x = jax.random.normal(k_x, (batch, input_dim), jnp.float32)
    params = init_params(k_p, input_dim, output_dim, prior_sigma=0.1)
    ref = reference_forward(x, params)

    # fast path: n_pad=256 fits in a single grid step
    out = jax.block_until_ready(softmax_bnn_forward(x, params))
    assert out.shape == (batch, output_dim)
    assert bool(jnp.allclose(jnp.sum(out, axis=0), 1.0, atol=1e-4)), "softmax(dim=0) not normalized"
    assert bool(jnp.allclose(out, ref, atol=2e-5, rtol=1e-5)), "mismatch vs reference (fast path)"

    # multi-tile path: forces 2 batch tiles and exercises the online-softmax rescaling
    out2 = jax.block_until_ready(softmax_bnn_forward(x, params, tile_n=128))
    assert bool(jnp.allclose(out2, ref, atol=2e-5, rtol=1e-5)), "mismatch vs reference (tiled path)"

    print("KERNEL_OK")
</pallas_src>

<mosaic_0001>
module attributes {stable_mosaic.version = 11 : i64} {
  func.func @kernel(%arg0: i32, %arg1: memref<16x256xf32, #tpu.memory_space<vmem>>, %arg2: memref<32x16xf32, #tpu.memory_space<vmem>>, %arg3: memref<16x32xf32, #tpu.memory_space<vmem>>, %arg4: memref<4x16xf32, #tpu.memory_space<vmem>>, %arg5: memref<128x3xf32, #tpu.memory_space<vmem>>, %arg6: memref<4x256xf32, #tpu.memory_space<vmem>>, %arg7: memref<4x1xf32, #tpu.memory_space<vmem>>, %arg8: memref<4x1xf32, #tpu.memory_space<vmem>>) attributes {dimension_semantics = [#tpu.dimension_semantics<arbitrary>], iteration_bounds = array<i64: 1>, scalar_prefetch = 0 : i64, scratch_operands = 2 : i64, tpu.core_type = #tpu.core_type<tc>, window_params = [{transform_indices = @transform_0, window_bounds = array<i64: 16, 256>}, {pipeline_mode = #tpu.pipeline_mode<synchronous>, transform_indices = @transform_1, window_bounds = array<i64: 32, 16>}, {pipeline_mode = #tpu.pipeline_mode<synchronous>, transform_indices = @transform_2, window_bounds = array<i64: 16, 32>}, {pipeline_mode = #tpu.pipeline_mode<synchronous>, transform_indices = @transform_3, window_bounds = array<i64: 4, 16>}, {pipeline_mode = #tpu.pipeline_mode<synchronous>, transform_indices = @transform_4, window_bounds = array<i64: 128, 3>}, {pipeline_mode = #tpu.pipeline_mode<synchronous>, transform_indices = @transform_5, window_bounds = array<i64: 4, 256>}]} {
    %c0_i32 = arith.constant 0 : i32
    %0 = arith.cmpi eq, %arg0, %c0_i32 : i32
    %1 = arith.extui %0 : i1 to i32
    %c0_i32_0 = arith.constant 0 : i32
    %2 = arith.cmpi ne, %1, %c0_i32_0 : i32
    scf.if %2 {
      %cst_28 = arith.constant 0xFF800000 : f32
      %54 = vector.broadcast %cst_28 : f32 to vector<4x1xf32>
      %c0_29 = arith.constant 0 : index
      %c0_30 = arith.constant 0 : index
      %55 = vector.load %arg7[%c0_29, %c0_30] : memref<4x1xf32, #tpu.memory_space<vmem>>, vector<4x1xf32>
      tpu.vector_store %arg7[%c0_29, %c0_30], %54 {strides = array<i32>} : memref<4x1xf32, #tpu.memory_space<vmem>>, vector<4x1xf32>,
      %cst_31 = arith.constant 0.000000e+00 : f32
      %56 = vector.broadcast %cst_31 : f32 to vector<4x1xf32>
      %c0_32 = arith.constant 0 : index
      %c0_33 = arith.constant 0 : index
      %57 = vector.load %arg8[%c0_32, %c0_33] : memref<4x1xf32, #tpu.memory_space<vmem>>, vector<4x1xf32>
      tpu.vector_store %arg8[%c0_32, %c0_33], %56 {strides = array<i32>} : memref<4x1xf32, #tpu.memory_space<vmem>>, vector<4x1xf32>,
    } else {
    }
    %c0 = arith.constant 0 : index
    %c0_1 = arith.constant 0 : index
    %3 = vector.load %arg5[%c0, %c0_1] : memref<128x3xf32, #tpu.memory_space<vmem>>, vector<128x3xf32>
    %4 = vector.extract_strided_slice %3 {offsets = [0, 0], sizes = [32, 1], strides = [1, 1]} : vector<128x3xf32> to vector<32x1xf32>
    %5 = vector.extract_strided_slice %3 {offsets = [0, 1], sizes = [16, 1], strides = [1, 1]} : vector<128x3xf32> to vector<16x1xf32>
    %6 = vector.extract_strided_slice %3 {offsets = [0, 2], sizes = [4, 1], strides = [1, 1]} : vector<128x3xf32> to vector<4x1xf32>
    %c0_2 = arith.constant 0 : index
    %c0_3 = arith.constant 0 : index
    %7 = vector.load %arg1[%c0_2, %c0_3] : memref<16x256xf32, #tpu.memory_space<vmem>>, vector<16x256xf32>
    %c0_4 = arith.constant 0 : index
    %c0_5 = arith.constant 0 : index
    %8 = vector.load %arg2[%c0_4, %c0_5] : memref<32x16xf32, #tpu.memory_space<vmem>>, vector<32x16xf32>
    %cst = arith.constant dense<0.000000e+00> : vector<32x256xf32>
    %9 = tpu.matmul %8, %7, %cst {dimension_numbers = #tpu.dot_dimension_numbers<[1], [0], [0], [1], [0, 0, 1, 1], [], []>} : vector<32x16xf32>, vector<16x256xf32>, vector<32x256xf32> -> vector<32x256xf32>
    %10 = vector.broadcast %4 : vector<32x1xf32> to vector<32x256xf32>
    %11 = arith.addf %9, %10 : vector<32x256xf32>
    %cst_6 = arith.constant 0.000000e+00 : f32
    %12 = vector.broadcast %cst_6 : f32 to vector<32x256xf32>
    %13 = arith.maximumf %11, %12 : vector<32x256xf32>
    %c0_7 = arith.constant 0 : index
    %c0_8 = arith.constant 0 : index
    %14 = vector.load %arg3[%c0_7, %c0_8] : memref<16x32xf32, #tpu.memory_space<vmem>>, vector<16x32xf32>
    %cst_9 = arith.constant dense<0.000000e+00> : vector<16x256xf32>
    %15 = tpu.matmul %14, %13, %cst_9 {dimension_numbers = #tpu.dot_dimension_numbers<[1], [0], [0], [1], [0, 0, 1, 1], [], []>} : vector<16x32xf32>, vector<32x256xf32>, vector<16x256xf32> -> vector<16x256xf32>
    %16 = vector.broadcast %5 : vector<16x1xf32> to vector<16x256xf32>
    %17 = arith.addf %15, %16 : vector<16x256xf32>
    %cst_10 = arith.constant 0.000000e+00 : f32
    %18 = vector.broadcast %cst_10 : f32 to vector<16x256xf32>
    %19 = arith.maximumf %17, %18 : vector<16x256xf32>
    %c0_11 = arith.constant 0 : index
    %c0_12 = arith.constant 0 : index
    %20 = vector.load %arg4[%c0_11, %c0_12] : memref<4x16xf32, #tpu.memory_space<vmem>>, vector<4x16xf32>
    %cst_13 = arith.constant dense<0.000000e+00> : vector<4x256xf32>
    %21 = tpu.matmul %20, %19, %cst_13 {dimension_numbers = #tpu.dot_dimension_numbers<[1], [0], [0], [1], [0, 0, 1, 1], [], []>} : vector<4x16xf32>, vector<16x256xf32>, vector<4x256xf32> -> vector<4x256xf32>
    %22 = vector.broadcast %6 : vector<4x1xf32> to vector<4x256xf32>
    %23 = arith.addf %21, %22 : vector<4x256xf32>
    %c256_i32 = arith.constant 256 : i32
    %24 = arith.muli %arg0, %c256_i32 : i32
    %25 = tpu.assume_multiple %24, 256 : i32
    %c0_14 = arith.constant 0 : index
    %26 = arith.index_cast %25 : i32 to index
    %27 = vector.load %arg6[%c0_14, %26] : memref<4x256xf32, #tpu.memory_space<vmem>>, vector<4x256xf32>
    tpu.vector_store %arg6[%c0_14, %26], %23 {strides = array<i32>} : memref<4x256xf32, #tpu.memory_space<vmem>>, vector<4x256xf32>,
    %28 = tpu.iota {dimensions = array<i32: 1>} : vector<4x256xi32>
    %29 = vector.broadcast %25 : i32 to vector<4x256xi32>
    %30 = arith.addi %28, %29 : vector<4x256xi32>
    %c200_i32 = arith.constant 200 : i32
    %31 = vector.broadcast %c200_i32 : i32 to vector<4x256xi32>
    %32 = arith.cmpi slt, %30, %31 : vector<4x256xi32>
    %cst_15 = arith.constant 0xFF800000 : f32
    %33 = vector.broadcast %cst_15 : f32 to vector<4x256xf32>
    %34 = arith.select %32, %23, %33 : vector<4x256xi1>, vector<4x256xf32>
    %cst_16 = arith.constant dense<0xFF800000> : vector<4xf32>
    %35 = vector.multi_reduction <maximumf>, %34, %cst_16 [1] : vector<4x256xf32> to vector<4xf32>
    %36 = vector.shape_cast %35 : vector<4xf32> to vector<4x1xf32>
    %c0_17 = arith.constant 0 : index
    %c0_18 = arith.constant 0 : index
    %37 = vector.load %arg7[%c0_17, %c0_18] : memref<4x1xf32, #tpu.memory_space<vmem>>, vector<4x1xf32>
    %38 = arith.maximumf %37, %36 : vector<4x1xf32>
    %39 = vector.broadcast %38 : vector<4x1xf32> to vector<4x256xf32>
    %40 = arith.subf %34, %39 : vector<4x256xf32>
    %41 = math.exp %40 : vector<4x256xf32>
    %cst_19 = arith.constant dense<0.000000e+00> : vector<4xf32>
    %42 = vector.multi_reduction <add>, %41, %cst_19 [1] : vector<4x256xf32> to vector<4xf32>
    %43 = vector.shape_cast %42 : vector<4xf32> to vector<4x1xf32>
    %c0_20 = arith.constant 0 : index
    %c0_21 = arith.constant 0 : index
    %44 = vector.load %arg8[%c0_20, %c0_21] : memref<4x1xf32, #tpu.memory_space<vmem>>, vector<4x1xf32>
    %45 = arith.subf %37, %38 : vector<4x1xf32>
    %46 = math.exp %45 : vector<4x1xf32>
    %47 = arith.mulf %44, %46 : vector<4x1xf32>
    %48 = arith.addf %47, %43 : vector<4x1xf32>
    %c0_22 = arith.constant 0 : index
    %c0_23 = arith.constant 0 : index
    %49 = vector.load %arg8[%c0_22, %c0_23] : memref<4x1xf32, #tpu.memory_space<vmem>>, vector<4x1xf32>
    tpu.vector_store %arg8[%c0_22, %c0_23], %48 {strides = array<i32>} : memref<4x1xf32, #tpu.memory_space<vmem>>, vector<4x1xf32>,
    %c0_24 = arith.constant 0 : index
    %c0_25 = arith.constant 0 : index
    %50 = vector.load %arg7[%c0_24, %c0_25] : memref<4x1xf32, #tpu.memory_space<vmem>>, vector<4x1xf32>
    tpu.vector_store %arg7[%c0_24, %c0_25], %38 {strides = array<i32>} : memref<4x1xf32, #tpu.memory_space<vmem>>, vector<4x1xf32>,
    %c0_i32_26 = arith.constant 0 : i32
    %51 = arith.cmpi eq, %arg0, %c0_i32_26 : i32
    %52 = arith.extui %51 : i1 to i32
    %c0_i32_27 = arith.constant 0 : i32
    %53 = arith.cmpi ne, %52, %c0_i32_27 : i32
    scf.if %53 {
      %c0_28 = arith.constant 0 : index
      %c0_29 = arith.constant 0 : index
      %54 = vector.load %arg7[%c0_28, %c0_29] : memref<4x1xf32, #tpu.memory_space<vmem>>, vector<4x1xf32>
      %c0_30 = arith.constant 0 : index
      %c0_31 = arith.constant 0 : index
      %55 = vector.load %arg8[%c0_30, %c0_31] : memref<4x1xf32, #tpu.memory_space<vmem>>, vector<4x1xf32>
      %cst_32 = arith.constant 1.000000e+00 : f32
      %56 = vector.broadcast %cst_32 : f32 to vector<4x1xf32>
      %57 = arith.divf %56, %55 : vector<4x1xf32>
      %c0_i32_33 = arith.constant 0 : i32
      %c1_i32 = arith.constant 1 : i32
      %58 = arith.muli %c0_i32_33, %c1_i32 : i32
      %c0_i32_34 = arith.constant 0 : i32
      %59 = arith.addi %c0_i32_34, %58 : i32
      %c256_i32_35 = arith.constant 256 : i32
      %60 = arith.muli %59, %c256_i32_35 : i32
      %61 = tpu.assume_multiple %60, 256 : i32
      %c0_36 = arith.constant 0 : index
      %62 = arith.index_cast %61 : i32 to index
      %63 = vector.load %arg6[%c0_36, %62] : memref<4x256xf32, #tpu.memory_space<vmem>>, vector<4x256xf32>
      %64 = vector.broadcast %54 : vector<4x1xf32> to vector<4x256xf32>
      %65 = arith.subf %63, %64 : vector<4x256xf32>
      %66 = math.exp %65 : vector<4x256xf32>
      %67 = vector.broadcast %57 : vector<4x1xf32> to vector<4x256xf32>
      %68 = arith.mulf %66, %67 : vector<4x256xf32>
      %c0_37 = arith.constant 0 : index
      %69 = arith.index_cast %61 : i32 to index
      %70 = vector.load %arg6[%c0_37, %69] : memref<4x256xf32, #tpu.memory_space<vmem>>, vector<4x256xf32>
      tpu.vector_store %arg6[%c0_37, %69], %68 {strides = array<i32>} : memref<4x256xf32, #tpu.memory_space<vmem>>, vector<4x256xf32>,
      %c1_i32_38 = arith.constant 1 : i32
    } else {
    }
    return
  }
  func.func @transform_0(%arg0: i32) -> (i32, i32) {
    %c0_i32 = arith.constant 0 : i32
    %c0_i32_0 = arith.constant 0 : i32
    return %c0_i32, %arg0 : i32, i32
  }
  func.func @transform_1(%arg0: i32) -> (i32, i32) {
    %c0_i32 = arith.constant 0 : i32
    %c0_i32_0 = arith.constant 0 : i32
    %c0_i32_1 = arith.constant 0 : i32
    return %c0_i32, %c0_i32_0 : i32, i32
  }
  func.func @transform_2(%arg0: i32) -> (i32, i32) {
    %c0_i32 = arith.constant 0 : i32
    %c0_i32_0 = arith.constant 0 : i32
    %c0_i32_1 = arith.constant 0 : i32
    return %c0_i32, %c0_i32_0 : i32, i32
  }
  func.func @transform_3(%arg0: i32) -> (i32, i32) {
    %c0_i32 = arith.constant 0 : i32
    %c0_i32_0 = arith.constant 0 : i32
    %c0_i32_1 = arith.constant 0 : i32
    return %c0_i32, %c0_i32_0 : i32, i32
  }
  func.func @transform_4(%arg0: i32) -> (i32, i32) {
    %c0_i32 = arith.constant 0 : i32
    %c0_i32_0 = arith.constant 0 : i32
    %c0_i32_1 = arith.constant 0 : i32
    return %c0_i32, %c0_i32_0 : i32, i32
  }
  func.func @transform_5(%arg0: i32) -> (i32, i32) {
    %c0_i32 = arith.constant 0 : i32
    %c0_i32_0 = arith.constant 0 : i32
    %c0_i32_1 = arith.constant 0 : i32
    return %c0_i32, %c0_i32_0 : i32, i32
  }
}

</mosaic_0001>

<bundles_post_ra>
// kernel: tpu_custom_call.1
= control target key start
LH: loop header
LB: loop body
LE: loop exit
PB: predicated region body
PF: predicated region fallthrough
CT: control target
= control target key end

     0   :  { %v524_v5 = vmov 0.0   ;;  %v525_v6 = vmov 0   ;;  %vm60_vm0 = vcmask 130048   ;;  %s648_s0 = inlined_call_operand.vmem [shape: f32[16,256], index: 0, kind: input, shape index: {}]   ;;  %s649_s1 = inlined_call_operand.vmem [shape: f32[32,16], index: 1, kind: input, shape index: {}]   ;;  %s650_s2 = inlined_call_operand.vmem [shape: f32[16,32], index: 2, kind: input, shape index: {}]   ;;  %s651_s3 = inlined_call_operand.vmem [shape: f32[4,16], index: 3, kind: input, shape index: {}]   ;;  %s652_s4 = inlined_call_operand.vmem [shape: f32[128,3], index: 4, kind: input, shape index: {}]   ;;  %s653_s5 = inlined_call_operand.hbm [shape: f32[4,256], index: 5, kind: output, shape index: {}]  }
   0x1   :  { %v33_v0 = vld [vmem:[%s648_s0 + $0x8] sm:$0xff]  ;;  %v35_v1 = vld [vmem:[%s648_s0 + $0x18] sm:$0xff]  ;;  %v32_v2 = vld [vmem:[%s648_s0] sm:$0xff]  ;;  %137 = vmatprep.mubr.f32.mxu0 %v524_v5  ;;  %483 = vset.pattern.permute.xlu0 %v525_v6 }
   0x2   :  { %v460_v3 = vpack.c.bf16 %v35_v1, %v33_v0  ;;  %v34_v4 = vld [vmem:[%s648_s0 + $0x10] sm:$0xff]  ;;  %v578_v8 = vld [vmem:[%s652_s4] sm:$0xff]  ;;  %484 = vset.pattern.permute.xlu1 %v525_v6  ;;  %251 = vmatprep.mubr.f32.mxu1 %v524_v5  ;;  %v29_v11 = vld [vmem:[%s652_s4 + $0x8] sm:$0xff] }
   0x3   :  { %v462_v7 = vpack.c.bf16 %v34_v4, %v32_v2  ;;  %42 = vperm.xlu0 %483, %v578_v8   ;;  %v30_v9 = vld [vmem:[%s652_s4 + $0x10] sm:$0xff]  ;;  %v36_v10 = vld [vmem:[%s649_s1] sm:$0xff] }
   0x4   :  { %461 = vmatprep.subr.bf16.mxu0 %v460_v3  ;;  %52 = vperm.xlu1 %484, %v30_v9  }
   0x5   :  { %463 = vmatpush1.bf16.msra.mxu0 %v462_v7 }
   0x6   :  { %10 = vsyncpa [#allocation5], 0  ;;  %v31_v12 = vld [vmem:[%s652_s4 + $0x18] sm:$0xff]  ;;  %v37_v13 = vld [vmem:[%s649_s1 + $0x8] sm:$0xff]  ;;  %v526_v16 = vmov 1   ;;  %vm180_vm1 = vcmask 261120  }
   0x7   :  { %47 = vperm.xlu0 %483, %v29_v11   ;;  %v38_v14 = vld [vmem:[%s649_s1 + $0x10] sm:$0xff]  ;;  %v39_v15 = vld [vmem:[%s649_s1 + $0x18] sm:$0xff]  ;;  %v170_v49 = vld [vmem:[%s650_s2] sm:$0xff]  ;;  %v527_v51 = vmov 2   ;;  %vm367_vm3 = vcmask 1043456   ;;  %vm25_vm4 = vcmask 3072  }
   0x8   :  { %453 = vmatmul.mubr.msk.f32.vlgmr.msra.gmra.mrb[0].mxu0 %vm60_vm0, %v36_v10  ;;  %57 = vperm.xlu1 %484, %v31_v12   ;;  %v171_v50 = vld [vmem:[%s650_s2 + $0x8] sm:$0xff]  ;;  %v268_v4 = vld [vmem:[%s651_s3] sm:$0xf]  ;;  %27 = vst.msk [vmem:[#allocation3] sm:$0xf] %vm25_vm4, %v524_v5  ;;  %s530_s3 = smov [#allocation4]  }
   0x9   :  { %143 = vmatprep.mubr.f32.mxu0 %v524_v5  ;;  %s443_s19 = sshll.u32 %s530_s3, 4  ;;  %s444_s19 = int_to_ptr.vmem [resolvable:$true] %s443_s19 }
   0xa   :  { %s500_s20 = scalar_lea.vmem %s444_s19, 128  ;;  %p505_p1 = scmp.lt.s32.totalorder %s444_s19, %s444_s19 }
   0xb   :  { %485 = vset.pattern.permute.xlu0 %v526_v16  ;;  %p501_p0 = scmp.ne.s32.totalorder %s444_s19, %s500_s20  ;;  %p506_p2 = scmp.lt.s32.totalorder %s500_s20, %s500_s20 }
   0xc   :  { %454 = vmatmul.mubr.msk.f32.gmra.mrb[2].mxu0 %vm60_vm0, %v37_v13  ;;  %486 = vset.pattern.permute.xlu1 %v526_v16 }
   0xd   :  { %149 = vmatprep.mubr.f32.mxu0 %v524_v5  ;;  %173 = vperm.xlu0 %485, %v578_v8   ;;  %p507_p3 = por %p506_p2, %p505_p1 }
   0xe   :  { %177 = vperm.xlu1 %486, %v29_v11  }
   0xf   :  { %p508_p4 = pnand %p507_p3, %p501_p0 }
  0x10   :  { %455 = vmatmul.mubr.msk.f32.gmra.mrb[4].mxu0 %vm60_vm0, %v38_v14 }
  0x11   :  { %155 = vmatprep.mubr.f32.mxu0 %v524_v5  ;;  %489 = vset.pattern.permute.xlu0 %v525_v6 }
  0x12   :  { %487 = vset.pattern.permute.xlu1 %v527_v51 }
  0x13   :  { %270 = vperm.xlu1 %487, %v578_v8  }
  0x14   :  { %456 = vmatmul.mubr.msk.f32.gmra.mrb[6].mxu0 %vm60_vm0, %v39_v15 }
  0x17   :  { %488 = vset.pattern.permute.xlu1 %v525_v6  ;;  %v357_v6 = vlaneseq }
  0x19   :  { %v358_v7 = vand.u32 127, %v357_v6 }
  0x1b   :  { %v359_v8 = vadd.s32 128, %v358_v7 }
  0x1d   :  { %vm364_vm2 = vcmp.lt.s32.totalorder %v359_v8, 200 }
  0x82   :  { %v43_v17 = vpop.permute.xlu0 %42 }
  0x83   :  { %v53_v26 = vpop.permute.xlu1 %52 }
  0x86   :  { %v48_v20 = vpop.permute.xlu0 %47 }
  0x87   :  { %v58_v37 = vpop.permute.xlu1 %57 }
  0x8c   :  { %v174_v52 = vpop.permute.xlu0 %173 }
  0x8d   :  { %v178_v55 = vpop.permute.xlu1 %177 }
  0x92   :  { %v271_v9 = vpop.permute.xlu1 %270 }
  0xdb   :  { %v139_v18 = vpop.f32.mrb[0].mxu0 }
  0xdc   :  { %v141_v19 = vpop.f32.mrb[1].mxu0  ;;  %v140_v21 = vadd.f32 %v139_v18, %v43_v17  ;;  %v528_v18 = vmov -inf  }
  0xdd   :  { %v142_v22 = vadd.f32 %v141_v19, %v43_v17  ;;  %26 = vst.msk [vmem:[#allocation2] sm:$0xf] %vm25_vm4, %v528_v18 }
  0xde   :  { %v162_v28 = vmax.f32 %v140_v21, 0.0 }
  0xdf   :  { %v145_v23 = vpop.f32.mrb[2].mxu0  ;;  %v163_v30 = vmax.f32 %v142_v22, 0.0 }
  0xe0   :  { %v146_v24 = vadd.f32 %v145_v23, %v48_v20  ;;  %v147_v25 = vpop.f32.mrb[3].mxu0 }
  0xe1   :  { %v148_v27 = vadd.f32 %v147_v25, %v48_v20 }
  0xe2   :  { %v164_v29 = vmax.f32 %v146_v24, 0.0 }
  0xe3   :  { %v165_v31 = vmax.f32 %v148_v27, 0.0  ;;  %v151_v32 = vpop.f32.mrb[4].mxu0 }
  0xe4   :  { %v153_v33 = vpop.f32.mrb[5].mxu0  ;;  %v466_v34 = vpack.c.bf16 %v164_v29, %v162_v28  ;;  %v152_v36 = vadd.f32 %v151_v32, %v53_v26  ;;  %v373_v19 = vld [vmem:[#allocation2] sm:$0xf] }
  0xe5   :  { %v464_v35 = vpack.c.bf16 %v165_v31, %v163_v30  ;;  %v154_v38 = vadd.f32 %v153_v33, %v53_v26 }
  0xe6   :  { %v166_v43 = vmax.f32 %v152_v36, 0.0 }
  0xe7   :  { %v157_v39 = vpop.f32.mrb[6].mxu0  ;;  %465 = vmatprep.subr.bf16.mxu1 %v464_v35  ;;  %v167_v45 = vmax.f32 %v154_v38, 0.0  ;;  %v391_v35 = vld [vmem:[#allocation3] sm:$0xf] }
  0xe8   :  { %v158_v40 = vadd.f32 %v157_v39, %v58_v37  ;;  %v159_v41 = vpop.f32.mrb[7].mxu0  ;;  %467 = vmatpush1.bf16.msra.mxu1 %v466_v34 }
  0xe9   :  { %v160_v42 = vadd.f32 %v159_v41, %v58_v37  ;;  %v529_v41 = vmov 839922192  }
  0xea   :  { %v168_v44 = vmax.f32 %v158_v40, 0.0 }
  0xeb   :  { %v169_v46 = vmax.f32 %v160_v42, 0.0  ;;  %v413_v42 = vunpack.c.l.s4 %v529_v41 }
  0xec   :  { %v470_v47 = vpack.c.bf16 %v168_v44, %v166_v43  ;;  %v416_v44 = vshrl.u32 %v357_v6, 7 }
  0xed   :  { %v468_v48 = vpack.c.bf16 %v169_v46, %v167_v45  ;;  %v414_v43 = vunpack.c.0.s8 %v413_v42 }
  0xef   :  { %469 = vmatprep.subr.bf16.mxu1 %v468_v48  ;;  %v417_v45 = vsub.s32 %v414_v43, %v416_v44 }
  0xf0   :  { %471 = vmatpush1.bf16.msra.mxu1 %v470_v47 }
  0xf3   :  { %457 = vmatmul.mubr.msk.f32.vlgmr.msra.gmra.mrb[0].mxu1 %vm180_vm1, %v170_v49 }
  0xf4   :  { %257 = vmatprep.mubr.f32.mxu1 %v524_v5 }
  0xf7   :  { %458 = vmatmul.mubr.msk.f32.gmra.mrb[2].mxu1 %vm180_vm1, %v171_v50 }
  0xf8   :  { %340 = vmatprep.mubr.f32.mxu1 %v524_v5 }
 0x1c6   :  { %v253_v53 = vpop.f32.mrb[0].mxu1 }
 0x1c7   :  { %v255_v54 = vpop.f32.mrb[1].mxu1  ;;  %v254_v56 = vadd.f32 %v253_v53, %v174_v52 }
 0x1c8   :  { %v256_v57 = vadd.f32 %v255_v54, %v174_v52 }
 0x1c9   :  { %v264_v62 = vmax.f32 %v254_v56, 0.0 }
 0x1ca   :  { %v259_v58 = vpop.f32.mrb[2].mxu1  ;;  %v265_v0 = vmax.f32 %v256_v57, 0.0 }
 0x1cb   :  { %v260_v59 = vadd.f32 %v259_v58, %v178_v55  ;;  %v261_v60 = vpop.f32.mrb[3].mxu1 }
 0x1cc   :  { %v262_v61 = vadd.f32 %v261_v60, %v178_v55 }
 0x1cd   :  { %v266_v63 = vmax.f32 %v260_v59, 0.0 }
 0x1ce   :  { %v267_v1 = vmax.f32 %v262_v61, 0.0 }
 0x1cf   :  { %v474_v2 = vpack.c.bf16 %v266_v63, %v264_v62 }
 0x1d0   :  { %v472_v3 = vpack.c.bf16 %v267_v1, %v265_v0 }
 0x1d2   :  { %473 = vmatprep.subr.bf16.mxu1 %v472_v3 }
 0x1d3   :  { %475 = vmatpush1.bf16.msra.mxu1 %v474_v2 }
 0x1d6   :  { %459 = vmatmul.mubr.msk.f32.vlgmr.msra.gmra.mrb[4].mxu1 %vm60_vm0, %v268_v4 }
 0x2a9   :  { %v342_v10 = vpop.f32.mrb[4].mxu1 }
 0x2aa   :  { %v343_v11 = vadd.f32 %v342_v10, %v271_v9  ;;  %v344_v12 = vpop.f32.mrb[5].mxu1 }
 0x2ab   :  { %v345_v13 = vadd.f32 %v344_v12, %v271_v9 }
 0x2ac   :  { %v368_v15 = vsel %vm367_vm3, %v343_v11, -inf }
 0x2ad   :  { %v366_v14 = vsel %vm364_vm2, %v345_v13, -inf  ;;  %v350_v48 = vcombine.low %v343_v11, %v345_v13 }
 0x2ae   :  { %v369_v16 = vsel %vm367_vm3, %v366_v14, -inf }
 0x2af   :  { %v370_v17 = vmax.f32 %v368_v15, %v369_v16 }
 0x2b1   :  { %371 = vmax.xlane.f32.xlu0 %v370_v17 }
 0x33e   :  { %v372_v20 = vpop.xlane.xlu0 %371 }
 0x33f   :  { %v374_v21 = vmax.f32 %v373_v19, %v372_v20 }
 0x341   :  { %v392_v22 = vsub.f32 %v373_v19, %v374_v21  ;;  %399 = vst.msk [vmem:[#allocation2] sm:$0xf] %vm25_vm4, %v374_v21  ;;  %377 = vperm.xlu1 %488, %v374_v21  }
 0x343   :  { %v393_v33 = vmul.f32 1.442695, %v392_v22 }
 0x348   :  { %v403_v23 = vld [vmem:[#allocation2] sm:$0xf] }
 0x349   :  { %410 = vperm.xlu0 %489, %v403_v23  }
 0x3c0   :  { %v378_v24 = vpop.permute.xlu1 %377 }
 0x3c1   :  { %v380_v25 = vsub.f32 %v343_v11, %v378_v24  ;;  %v381_v26 = vsub.f32 %v366_v14, %v378_v24 }
 0x3c3   :  { %v382_v27 = vmul.f32 1.442695, %v380_v25  ;;  %v384_v28 = vmul.f32 1.442695, %v381_v26 }
 0x3c5   :  { %490 = vpow2.f32 %v382_v27 }
 0x3c6   :  { %492 = vpow2.f32 %v384_v28 }
 0x3c7   :  { %494 = vpow2.f32 %v393_v33 }
 0x3c8   :  { %v411_v46 = vpop.permute.xlu0 %410 }
 0x3c9   :  { %v418_v47 = vrot.slane %v411_v46, %v417_v45 }
 0x3cb   :  { %v420_v49 = vsub.f32 %v350_v48, %v418_v47 }
 0x3cd   :  { %v421_v50 = vmul.f32 1.442695, %v420_v49 }
 0x3cf   :  { %v491_v29 = vpop.eup %490 }
 0x3d0   :  { %v493_v30 = vpop.eup %492  ;;  %v386_v5 = vsel %vm367_vm3, %v491_v29, 0.0 }
 0x3d1   :  { %v387_v31 = vsel %vm367_vm3, %v493_v30, 0.0  ;;  %v495_v34 = vpop.eup %494 }
 0x3d2   :  { %v388_v32 = vadd.f32 %v387_v31, %v386_v5  ;;  %v395_v36 = vmul.f32 %v495_v34, %v391_v35 }
 0x3d4   :  { %389 = vadd.xlane.f32.xlu1 %v388_v32 }
 0x461   :  { %v390_v37 = vpop.xlane.xlu1 %389 }
 0x462   :  { %v396_v38 = vadd.f32 %v395_v36, %v390_v37 }
 0x464   :  { %398 = vst.msk [vmem:[#allocation3] sm:$0xf] %vm25_vm4, %v396_v38 }
 0x46b   :  { %v404_v39 = vld [vmem:[#allocation3] sm:$0xf] }
 0x46c   :  { %496 = vrcp.f32 %v404_v39 }
 0x46d   :  { %498 = vpow2.f32 %v421_v50 }
 0x476   :  { %v497_v40 = vpop.eup %496 }
 0x477   :  { %425 = vperm.xlu1 %488, %v497_v40   ;;  %v499_v53 = vpop.eup %498 }
 0x4f6   :  { %v426_v51 = vpop.permute.xlu1 %425 }
 0x4f7   :  { %v433_v52 = vrot.slane %v426_v51, %v417_v45 }
 0x4f9   :  { %v435_v54 = vmul.f32 %v499_v53, %v433_v52 }
 0x4fb   :  { %436 = vst [vmem:[#allocation4] sm:$0xff] %v435_v54 }
 0x4fc   :  { %511 = shalt.err (!%p508_p4)
}
 0x4fd   :  { %s512_s23 = scalar_lea.hbm %s653_s5, 128 }
 0x4fe   :  { %p513_p5 = scmp.ne.s32.totalorder %s653_s5, %s512_s23  ;;  %p516_p6 = scmp.lt.u32.totalorder %s512_s23, %s653_s5 }
 0x500   :  { %p518_p7 = pnand %p516_p6, %p513_p5 }
 0x502   :  { %521 = shalt.err (!%p518_p7)
}
 0x503   :  { %446 = dma.vmem_to_hbm [thread:$0]  %s444_s19, 128, %s653_s5, [#allocation5]  }
 0x504   :  { %522 = dma.done.wait [#allocation5], 128  }
 0x505   :  { %523 = vsyncadd [#allocation5], 4294967168 }
 0x506   :  { %450 = vsyncpa [#allocation5], 1 }

</bundles_post_ra>
